<compile_context>
chip_gen: v5e
topology: v5e:2x2
jax: 0.10.0
libtpu: 0.0.40
codegen_flags: <defaults>
</compile_context>

<pallas_src>
import jax
import jax.numpy as jnp
from jax.experimental import pallas as pl
from jax.experimental.pallas import tpu as pltpu


TILE_B = 512  # batch tile for the gridded large-B path (multiple of 8)


def make_critic_kernel(state_size):
    """Kernel over one batch tile. params slab layout is described above."""
    S = state_size

    def critic_kernel(x_ref, p_ref, out_ref):
        x = x_ref[...]                      # (Bt, S)

        # Static ref slices into the packed params slab (free).
        w1 = p_ref[0:S, :]                  # (S, 2L)   fused first-layer weight
        b1 = p_ref[S:S + 1, :]              # (1, 2L)   fused first-layer bias
        b2 = p_ref[S + 1:S + 2, :]          # (1, 2L)   lanes 0/1 = b2_mu/b2_lv
        w2 = p_ref[S + 2:S + 4, :]          # (2, 2L)   masked second-layer rows

        # Fused first layers of both heads: one (Bt,S)@(S,2L) MXU matmul,
        # hidden = 128 lanes (fully lane-dense).
        h = jnp.dot(x, w1, preferred_element_type=jnp.float32) + b1
        # Dropout(p=0.6) in eval mode == identity.
        h = jnp.maximum(h, 0.0)

        # Second layers off the MXU: VPU multiply + lane reduction.
        # Row 0 of w2 is zero outside the mu head's lanes (and vice versa),
        # so full-lane reductions are exact.
        mu = jnp.sum(h * w2[0:1, :], axis=-1, keepdims=True) + b2[0:1, 0:1]
        lv = jnp.sum(h * w2[1:2, :], axis=-1, keepdims=True) + b2[0:1, 1:2]

        out = jnp.concatenate([mu, lv], axis=-1)   # (Bt, 2): col0=mu, col1=log_var
        out_ref[...] = out.astype(out_ref.dtype)

    return critic_kernel


def critic_forward(x, fused_params):
    """x: (B, state_size) f32. fused_params: dict from fuse_params()."""
    B, S = x.shape
    params = fused_params["params"]
    kernel = make_critic_kernel(S)

    if B >= TILE_B and B % TILE_B == 0:
        # Large-B path: grid over batch tiles; params block fetched once
        # (constant index_map) and resident across grid steps.
        out = pl.pallas_call(
            kernel,
            out_shape=jax.ShapeDtypeStruct((B, 2), jnp.float32),
            grid=(B // TILE_B,),
            in_specs=[
                pl.BlockSpec((TILE_B, S), lambda i: (i, 0)),
                pl.BlockSpec(params.shape, lambda i: (0, 0)),
            ],
            out_specs=pl.BlockSpec((TILE_B, 2), lambda i: (i, 0)),
            compiler_params=pltpu.CompilerParams(
                dimension_semantics=("parallel",)),
        )(x, params)
    else:
        # Tiny-B path (RL rollout sized): gridless, everything in VMEM.
        vmem = pl.BlockSpec(memory_space=pltpu.MemorySpace.VMEM)
        out = pl.pallas_call(
            kernel,
            out_shape=jax.ShapeDtypeStruct((B, 2), jnp.float32),
            in_specs=[vmem, vmem],
            out_specs=vmem,
        )(x, params)

    mu = out[:, 0:1]
    log_var = out[:, 1:2]
    return mu, log_var


def init_params(key, state_size, layer_size):
    """Deterministic xavier-uniform-ish init (weights_init_ equivalent).

    Weights stored as (in_features, out_features), i.e. transposed vs PyTorch.
    """
    ks = jax.random.split(key, 4)

    def xavier(k, fan_in, fan_out):
        lim = jnp.sqrt(6.0 / (fan_in + fan_out))
        return jax.random.uniform(k, (fan_in, fan_out), jnp.float32, -lim, lim)

    return {
        # mu head
        "w1_mu": xavier(ks[0], state_size, layer_size),
        "b1_mu": jnp.zeros((1, layer_size), jnp.float32),
        "w2_mu": xavier(ks[1], layer_size, 1),
        "b2_mu": jnp.zeros((1, 1), jnp.float32),
        # log_var head
        "w1_lv": xavier(ks[2], state_size, layer_size),
        "b1_lv": jnp.zeros((1, layer_size), jnp.float32),
        "w2_lv": xavier(ks[3], layer_size, 1),
        "b2_lv": jnp.zeros((1, 1), jnp.float32),
    }


def fuse_params(p, state_size, layer_size):
    """One-time fusion of both heads into a single lane-dense params slab."""
    two_l = 2 * layer_size
    rows = state_size + 4
    params = jnp.zeros((rows, two_l), jnp.float32)

    # rows 0:S -> fused first-layer weight [w1_mu || w1_lv]
    w1 = jnp.concatenate([p["w1_mu"], p["w1_lv"]], axis=1)
    params = params.at[0:state_size, :].set(w1)

    # row S -> fused first-layer bias [b1_mu || b1_lv]
    params = params.at[state_size, 0:layer_size].set(p["b1_mu"][0])
    params = params.at[state_size, layer_size:].set(p["b1_lv"][0])

    # row S+1 -> [b2_mu, b2_lv, 0, ...]
    params = params.at[state_size + 1, 0].set(p["b2_mu"][0, 0])
    params = params.at[state_size + 1, 1].set(p["b2_lv"][0, 0])

    # row S+2 -> w2_mu^T on lanes 0:L (zeros elsewhere)
    params = params.at[state_size + 2, 0:layer_size].set(p["w2_mu"][:, 0])
    # row S+3 -> w2_lv^T on lanes L:2L (zeros elsewhere)
    params = params.at[state_size + 3, layer_size:].set(p["w2_lv"][:, 0])

    return {"params": params}


def critic_reference(x, p):
    """Pure-JAX reference of the PyTorch forward (eval mode), per-head params."""
    h_mu = jnp.maximum(x @ p["w1_mu"] + p["b1_mu"], 0.0)
    mu = h_mu @ p["w2_mu"] + p["b2_mu"]
    h_lv = jnp.maximum(x @ p["w1_lv"] + p["b1_lv"], 0.0)
    lv = h_lv @ p["w2_lv"] + p["b2_lv"]
    return mu, lv


if __name__ == "__main__":
    key = jax.random.PRNGKey(0)
    k_x, k_p, k_xl = jax.random.split(key, 3)

    batch = 8
    state_size = 32
    layer_size = 64

    params = init_params(k_p, state_size, layer_size)
    fused = fuse_params(params, state_size, layer_size)

    # --- small-batch (gridless) path ---
    x = jax.random.normal(k_x, (batch, state_size), jnp.float32)
    mu, log_var = critic_forward(x, fused)
    jax.block_until_ready((mu, log_var))

    mu_ref, lv_ref = critic_reference(x, params)
    assert mu.shape == (batch, 1) and log_var.shape == (batch, 1)
    assert jnp.allclose(mu, mu_ref, atol=1e-5, rtol=1e-5)
    assert jnp.allclose(log_var, lv_ref, atol=1e-5, rtol=1e-5)

    # --- large-batch (gridded, parallel batch axis) path ---
    big_batch = 1024
    xl = jax.random.normal(k_xl, (big_batch, state_size), jnp.float32)
    mu_l, lv_l = critic_forward(xl, fused)
    jax.block_until_ready((mu_l, lv_l))

    mu_lr, lv_lr = critic_reference(xl, params)
    assert mu_l.shape == (big_batch, 1) and lv_l.shape == (big_batch, 1)
    assert jnp.allclose(mu_l, mu_lr, atol=1e-5, rtol=1e-5)
    assert jnp.allclose(lv_l, lv_lr, atol=1e-5, rtol=1e-5)

    print("KERNEL_OK")
</pallas_src>

<mosaic_0001>
module attributes {stable_mosaic.version = 11 : i64} {
  func.func @critic_kernel(%arg0: memref<8x32xf32, #tpu.memory_space<vmem>>, %arg1: memref<36x128xf32, #tpu.memory_space<vmem>>, %arg2: memref<8x2xf32, #tpu.memory_space<vmem>>) attributes {dimension_semantics = [], scalar_prefetch = 0 : i64, scratch_operands = 0 : i64, tpu.core_type = #tpu.core_type<tc>} {
    %c0 = arith.constant 0 : index
    %c0_0 = arith.constant 0 : index
    %0 = vector.load %arg0[%c0, %c0_0] : memref<8x32xf32, #tpu.memory_space<vmem>>, vector<8x32xf32>
    %c0_1 = arith.constant 0 : index
    %c0_2 = arith.constant 0 : index
    %1 = vector.load %arg1[%c0_1, %c0_2] : memref<36x128xf32, #tpu.memory_space<vmem>>, vector<32x128xf32>
    %c32 = arith.constant 32 : index
    %c0_3 = arith.constant 0 : index
    %2 = vector.load %arg1[%c32, %c0_3] : memref<36x128xf32, #tpu.memory_space<vmem>>, vector<1x128xf32>
    %c33 = arith.constant 33 : index
    %c0_4 = arith.constant 0 : index
    %3 = vector.load %arg1[%c33, %c0_4] : memref<36x128xf32, #tpu.memory_space<vmem>>, vector<1x128xf32>
    %c34 = arith.constant 34 : index
    %c0_5 = arith.constant 0 : index
    %4 = vector.load %arg1[%c34, %c0_5] : memref<36x128xf32, #tpu.memory_space<vmem>>, vector<2x128xf32>
    %cst = arith.constant dense<0.000000e+00> : vector<8x128xf32>
    %5 = tpu.matmul %0, %1, %cst {dimension_numbers = #tpu.dot_dimension_numbers<[1], [0], [0], [1], [0, 0, 1, 1], [], []>} : vector<8x32xf32>, vector<32x128xf32>, vector<8x128xf32> -> vector<8x128xf32>
    %6 = vector.broadcast %2 : vector<1x128xf32> to vector<8x128xf32>
    %7 = arith.addf %5, %6 : vector<8x128xf32>
    %cst_6 = arith.constant 0.000000e+00 : f32
    %8 = vector.broadcast %cst_6 : f32 to vector<8x128xf32>
    %9 = arith.maximumf %7, %8 : vector<8x128xf32>
    %10 = vector.extract_strided_slice %4 {offsets = [0, 0], sizes = [1, 128], strides = [1, 1]} : vector<2x128xf32> to vector<1x128xf32>
    %11 = vector.broadcast %10 : vector<1x128xf32> to vector<8x128xf32>
    %12 = arith.mulf %9, %11 : vector<8x128xf32>
    %cst_7 = arith.constant dense<0.000000e+00> : vector<8xf32>
    %13 = vector.multi_reduction <add>, %12, %cst_7 [1] : vector<8x128xf32> to vector<8xf32>
    %14 = vector.shape_cast %13 : vector<8xf32> to vector<8x1xf32>
    %15 = vector.extract_strided_slice %3 {offsets = [0, 0], sizes = [1, 1], strides = [1, 1]} : vector<1x128xf32> to vector<1x1xf32>
    %16 = vector.broadcast %15 : vector<1x1xf32> to vector<8x1xf32>
    %17 = arith.addf %14, %16 : vector<8x1xf32>
    %18 = vector.extract_strided_slice %4 {offsets = [1, 0], sizes = [1, 128], strides = [1, 1]} : vector<2x128xf32> to vector<1x128xf32>
    %19 = vector.broadcast %18 : vector<1x128xf32> to vector<8x128xf32>
    %20 = arith.mulf %9, %19 : vector<8x128xf32>
    %cst_8 = arith.constant dense<0.000000e+00> : vector<8xf32>
    %21 = vector.multi_reduction <add>, %20, %cst_8 [1] : vector<8x128xf32> to vector<8xf32>
    %22 = vector.shape_cast %21 : vector<8xf32> to vector<8x1xf32>
    %23 = vector.extract_strided_slice %3 {offsets = [0, 1], sizes = [1, 1], strides = [1, 1]} : vector<1x128xf32> to vector<1x1xf32>
    %24 = vector.broadcast %23 : vector<1x1xf32> to vector<8x1xf32>
    %25 = arith.addf %22, %24 : vector<8x1xf32>
    %26 = tpu.concatenate %17, %25 in 1 : vector<8x1xf32>, vector<8x1xf32> -> vector<8x2xf32>
    %c0_9 = arith.constant 0 : index
    %c0_10 = arith.constant 0 : index
    %27 = vector.load %arg2[%c0_9, %c0_10] : memref<8x2xf32, #tpu.memory_space<vmem>>, vector<8x2xf32>
    tpu.vector_store %arg2[%c0_9, %c0_10], %26 {strides = array<i32>} : memref<8x2xf32, #tpu.memory_space<vmem>>, vector<8x2xf32>,
    return
  }
}

</mosaic_0001>

<bundles_post_ra>
// kernel: tpu_custom_call.1
= control target key start
LH: loop header
LB: loop body
LE: loop exit
PB: predicated region body
PF: predicated region fallthrough
CT: control target
= control target key end

     0   :  { %7 = vsyncpa [#allocation3], 0  ;;  %s183_s0 = inlined_call_operand.hbm [shape: f32[8,32], index: 0, kind: input, shape index: {}]   ;;  %s184_s1 = inlined_call_operand.hbm [shape: f32[36,128], index: 1, kind: input, shape index: {}]   ;;  %s185_s2 = inlined_call_operand.vmem [shape: f32[8,2], index: 2, kind: output, shape index: {}]  }
   0x1   :  { %s14_s11 = sshll.u32 %s183_s0, 4  ;;  %s15_s11 = int_to_ptr.hbm [resolvable:$true] %s14_s11 }
   0x2   :  { %8 = vsyncpa [#allocation5], 0  ;;  %s155_s12 = smov [#allocation2]   ;;  %s24_s16 = sshll.u32 %s184_s1, 4  ;;  %s25_s16 = int_to_ptr.hbm [resolvable:$true] %s24_s16 }
   0x3   :  { %s16_s13 = sshll.u32 %s155_s12, 4  ;;  %s156_s17 = smov [#allocation4]   ;;  %s17_s13 = int_to_ptr.vmem [resolvable:$true] %s16_s13 }
   0x4   :  { %19 = dma.hbm_to_vmem [thread:$0]  %s15_s11, 128, %s17_s13, [#allocation3]  }
   0x5   :  { %s26_s18 = sshll.u32 %s156_s17, 4  ;;  %s157_s19 = smov 128   ;;  %s27_s18 = int_to_ptr.vmem [resolvable:$true] %s26_s18 }
   0x6   :  { %s158_s20 = smov 8  }
   0x7   :  { %32 = dma.hbm_to_vmem [thread:$0]  %s25_s16, 640, %s27_s18, [#allocation5], %s157_s19, %s157_s19, %s158_s20  }
   0x8   :  { %151 = dma.done.wait [#allocation3], 128  }
   0x9   :  { %152 = vsyncadd [#allocation3], 4294967168 }
   0xa   :  { %153 = dma.done.wait [#allocation5], 640  }
   0xb   :  { %154 = vsyncadd [#allocation5], 4294966656  ;;  %v45_v0 = vld [vmem:[#allocation4 + $0x18] sm:$0xff]  ;;  %v44_v1 = vld [vmem:[#allocation4 + $0x10] sm:$0xff]  ;;  %vm50_vm0 = vcmask 261120   ;;  %vm86_vm1 = vcmask 7168  }
   0xc   :  { %66 = vmatpush.msra.mxu0 %v45_v0  ;;  %v43_v2 = vld [vmem:[#allocation4 + $0x8] sm:$0xff]  ;;  %v42_v3 = vld [vmem:[#allocation4] sm:$0xff]  ;;  %v41_v4 = vld [vmem:[#allocation2] sm:$0xff]  ;;  %vm88_vm2 = vcmask 15360  }
   0xd   :  { %v101_v5 = vld [vmem:[#allocation4 + $0x20] ss:$0 sm:$0xff]  ;;  %v48_v6 = vld [vmem:[#allocation4 + $0x22] sm:$0x3]  ;;  %v102_v15 = vld [vmem:[#allocation4 + $0x21] ss:$0 sm:$0xff] }
   0xe   :  { %67 = vmatpush.msra.mxu0 %v44_v1  ;;  %v75_v9 = vperm.slane %v48_v6, 0  ;;  %v81_v12 = vperm.slane %v48_v6, 1 }
  0x10   :  { %68 = vmatpush.msra.mxu0 %v43_v2 }
  0x12   :  { %69 = vmatpush.msra.mxu0 %v42_v3 }
  0x13   :  { %96 = vmatmul.msk.f32.vlgmr.msra.gmra.mxu0 %vm50_vm0, %v41_v4 }
  0x90   :  { %v71_v7 = vpop.f32.mrf.mxu0 }
  0x91   :  { %v72_v8 = vadd.f32 %v101_v5, %v71_v7 }
  0x93   :  { %v74_v10 = vmax.f32 %v72_v8, 0.0 }
  0x95   :  { %v76_v11 = vmul.f32 %v75_v9, %v74_v10  ;;  %v82_v13 = vmul.f32 %v81_v12, %v74_v10 }
  0x97   :  { %77 = vadd.xlane.f32.xlu0 %v76_v11 }
  0x9f   :  { %83 = vadd.xlane.f32.xlu0 %v82_v13 }
 0x10a   :  { %v78_v14 = vpop.xlane.xlu0 %77 }
 0x10b   :  { %v80_v17 = vadd.f32 %v102_v15, %v78_v14 }
 0x112   :  { %v84_v16 = vpop.xlane.xlu0 %83 }
 0x113   :  { %v85_v18 = vadd.f32 %v102_v15, %v84_v16 }
 0x115   :  { %v87_v19 = vsel %vm86_vm1, %v80_v17, %v85_v18 }
 0x116   :  { %89 = vst.msk [vmem:[%s185_s2] sm:$0xff] %vm88_vm2, %v87_v19 }
 0x117   :  { %94 = vsyncpa [#allocation3], 1 }
 0x118   :  { %95 = vsyncpa [#allocation5], 1 }

</bundles_post_ra>
